<compile_context>
chip_gen: v5e
topology: v5e:2x2
jax: 0.10.0
libtpu: 0.0.40
codegen_flags: <defaults>
</compile_context>

<pallas_src>
import jax
import jax.numpy as jnp
from jax.experimental import pallas as pl
from jax.experimental.pallas import tpu as pltpu


def _round_up(x, m):
    return ((x + m - 1) // m) * m


def _sense_kernel(x_ref, w_ref, b_ref, o_ref):
    # x_ref: (tm, C)   w_ref: (C, tn)   b_ref: (1, tn)   o_ref: (tm, tn)
    # out = x @ w + b, accumulated in f32 on the MXU.
    acc = jnp.dot(x_ref[...], w_ref[...], preferred_element_type=jnp.float32)
    o_ref[...] = (acc + b_ref[...].astype(jnp.float32)).astype(o_ref.dtype)


def sense_layer_forward(x, weight, bias, n_senses, *, tm=512, tn=2048,
                        core_parallel_m=False):
    """x: (B, T, C); weight: (n_senses*C, C) [PyTorch layout]; bias: (n_senses*C,)."""
    B, T, C = x.shape
    N = weight.shape[0]                       # n_senses * C
    assert N == n_senses * C and weight.shape[1] == C

    M = B * T
    x2d = x.reshape(M, C)

    # Rows: pad only to the 8-sublane multiple (NOT to a tile multiple); the
    # partial last M block is handled by Pallas' masked stores.
    m_pad = _round_up(M, 8)
    if m_pad != M:
        x2d = jnp.pad(x2d, ((0, m_pad - M), (0, 0)))

    # Columns: one-time transpose to (C, N) -> lane-dense MXU RHS & output,
    # then pad N to a 128 multiple (no-op when already aligned).
    n_pad = _round_up(N, 128)
    wt = weight.T
    b = bias
    if n_pad != N:
        wt = jnp.pad(wt, ((0, 0), (0, n_pad - N)))
        b = jnp.pad(bias, ((0, n_pad - N),))
    b2d = b.reshape(1, n_pad)

    tm_eff = _round_up(max(8, min(tm, m_pad)), 8)
    tn_eff = min(_round_up(tn, 128), n_pad)

    grid_n = pl.cdiv(n_pad, tn_eff)
    grid_m = pl.cdiv(m_pad, tm_eff)

    itemsize = jnp.dtype(x.dtype).itemsize
    cost = pl.CostEstimate(
        flops=2 * m_pad * n_pad * C,
        transcendentals=0,
        # N outer / M inner: weight read once, x re-read per N tile, out written once.
        bytes_accessed=(grid_n * m_pad * C + C * n_pad + n_pad + m_pad * n_pad)
        * itemsize,
    )

    # VMEM budget derived from the double-buffered tiles (+ headroom), so tile
    # choices that fit v7x's 64 MiB/TC stay under the limit automatically.
    tile_bytes = 2 * (tm_eff * C + C * tn_eff + tn_eff + tm_eff * tn_eff) * itemsize
    vmem_limit = min(max(32 * 1024 * 1024, tile_bytes + 16 * 1024 * 1024),
                     100 * 1024 * 1024)

    m_sem = pltpu.CORE_PARALLEL if core_parallel_m else "parallel"

    out = pl.pallas_call(
        _sense_kernel,
        out_shape=jax.ShapeDtypeStruct((m_pad, n_pad), x.dtype),
        grid_spec=pltpu.PrefetchScalarGridSpec(
            num_scalar_prefetch=0,
            grid=(grid_n, grid_m),                               # N OUTER, M inner
            in_specs=[
                pl.BlockSpec((tm_eff, C), lambda j, i: (i, 0)),   # x: streamed over M
                pl.BlockSpec((C, tn_eff), lambda j, i: (0, j)),   # weight: fetched once per N tile
                pl.BlockSpec((1, tn_eff), lambda j, i: (0, j)),   # bias
            ],
            out_specs=pl.BlockSpec((tm_eff, tn_eff), lambda j, i: (i, j)),
        ),
        compiler_params=pltpu.CompilerParams(
            dimension_semantics=("arbitrary", m_sem),
            vmem_limit_bytes=vmem_limit,
        ),
        cost_estimate=cost,
    )(x2d, wt, b2d)

    if m_pad != M or n_pad != N:
        out = out[:M, :N]
    return out.reshape(B, T, n_senses, C)


def _reference(x, weight, bias, n_senses):
    B, T, C = x.shape
    return (x.reshape(B * T, C) @ weight.T + bias).reshape(B, T, n_senses, C)


if __name__ == "__main__":
    key = jax.random.PRNGKey(0)
    k1, k2, k3, k4, k5, k6 = jax.random.split(key, 6)

    # Config 1: matches the module defaults (embedding_size=32, n_senses=4).
    B, T, C = 2, 8, 32
    n_senses = 4
    x = jax.random.normal(k1, (B, T, C), dtype=jnp.float32)
    bound = 1.0 / (C ** 0.5)
    weight = jax.random.uniform(k2, (n_senses * C, C), jnp.float32, -bound, bound)
    bias = jax.random.uniform(k3, (n_senses * C,), jnp.float32, -bound, bound)

    y = sense_layer_forward(x, weight, bias, n_senses)
    y = jax.block_until_ready(y)
    ref = _reference(x, weight, bias, n_senses)
    assert y.shape == (B, T, n_senses, C)
    assert jnp.allclose(y, ref, atol=1e-5, rtol=1e-5)

    # Config 2: non-8/non-tile-aligned M -> multi-step M grid with a masked
    # partial last block (M = 300, tm = 128).
    B2, T2 = 3, 100
    x2 = jax.random.normal(k4, (B2, T2, C), dtype=jnp.float32)
    y2 = sense_layer_forward(x2, weight, bias, n_senses, tm=128)
    y2 = jax.block_until_ready(y2)
    ref2 = _reference(x2, weight, bias, n_senses)
    assert y2.shape == (B2, T2, n_senses, C)
    assert jnp.allclose(y2, ref2, atol=1e-5, rtol=1e-5)

    # Config 3: non-128-aligned N (n_senses=3 -> N=96) exercises the weight /
    # bias / output column-padding path.
    n_senses3 = 3
    w3 = jax.random.uniform(k5, (n_senses3 * C, C), jnp.float32, -bound, bound)
    b3 = jax.random.uniform(k6, (n_senses3 * C,), jnp.float32, -bound, bound)
    y3 = sense_layer_forward(x, w3, b3, n_senses3)
    y3 = jax.block_until_ready(y3)
    ref3 = _reference(x, w3, b3, n_senses3)
    assert y3.shape == (B, T, n_senses3, C)
    assert jnp.allclose(y3, ref3, atol=1e-5, rtol=1e-5)

    # Config 4: bf16 end-to-end I/O (f32 MXU accumulation kept inside the
    # kernel) — the recommended production dtype for this mem-bound kernel.
    xb = x.astype(jnp.bfloat16)
    wb = weight.astype(jnp.bfloat16)
    bb = bias.astype(jnp.bfloat16)
    y4 = sense_layer_forward(xb, wb, bb, n_senses)
    y4 = jax.block_until_ready(y4)
    assert y4.dtype == jnp.bfloat16 and y4.shape == (B, T, n_senses, C)
    assert jnp.allclose(y4.astype(jnp.float32), ref, atol=5e-2, rtol=5e-2)

    print("KERNEL_OK")
</pallas_src>

<mosaic_0001>
module attributes {stable_mosaic.version = 11 : i64} {
  func.func @_sense_kernel(%arg0: i32, %arg1: i32, %arg2: memref<16x32xf32, #tpu.memory_space<vmem>>, %arg3: memref<32x128xf32, #tpu.memory_space<vmem>>, %arg4: memref<1x128xf32, #tpu.memory_space<vmem>>, %arg5: memref<16x128xf32, #tpu.memory_space<vmem>>) attributes {dimension_semantics = [#tpu.dimension_semantics<arbitrary>, #tpu.dimension_semantics<parallel>], iteration_bounds = array<i64: 1, 1>, scalar_prefetch = 0 : i64, scratch_operands = 0 : i64, tpu.core_type = #tpu.core_type<tc>, window_params = [{transform_indices = @transform_0, window_bounds = array<i64: 16, 32>}, {transform_indices = @transform_1, window_bounds = array<i64: 32, 128>}, {transform_indices = @transform_2, window_bounds = array<i64: 1, 128>}, {transform_indices = @transform_3, window_bounds = array<i64: 16, 128>}]} {
    %c0 = arith.constant 0 : index
    %c0_0 = arith.constant 0 : index
    %0 = vector.load %arg2[%c0, %c0_0] : memref<16x32xf32, #tpu.memory_space<vmem>>, vector<16x32xf32>
    %c0_1 = arith.constant 0 : index
    %c0_2 = arith.constant 0 : index
    %1 = vector.load %arg3[%c0_1, %c0_2] : memref<32x128xf32, #tpu.memory_space<vmem>>, vector<32x128xf32>
    %cst = arith.constant dense<0.000000e+00> : vector<16x128xf32>
    %2 = tpu.matmul %0, %1, %cst {dimension_numbers = #tpu.dot_dimension_numbers<[1], [0], [0], [1], [0, 0, 1, 1], [], []>} : vector<16x32xf32>, vector<32x128xf32>, vector<16x128xf32> -> vector<16x128xf32>
    %c0_3 = arith.constant 0 : index
    %c0_4 = arith.constant 0 : index
    %3 = vector.load %arg4[%c0_3, %c0_4] : memref<1x128xf32, #tpu.memory_space<vmem>>, vector<1x128xf32>
    %4 = vector.broadcast %3 : vector<1x128xf32> to vector<16x128xf32>
    %5 = arith.addf %2, %4 : vector<16x128xf32>
    %c0_5 = arith.constant 0 : index
    %c0_6 = arith.constant 0 : index
    %6 = vector.load %arg5[%c0_5, %c0_6] : memref<16x128xf32, #tpu.memory_space<vmem>>, vector<16x128xf32>
    tpu.vector_store %arg5[%c0_5, %c0_6], %5 {strides = array<i32>} : memref<16x128xf32, #tpu.memory_space<vmem>>, vector<16x128xf32>,
    return
  }
  func.func @transform_0(%arg0: i32, %arg1: i32) -> (i32, i32) {
    %c0_i32 = arith.constant 0 : i32
    %c0_i32_0 = arith.constant 0 : i32
    return %arg1, %c0_i32 : i32, i32
  }
  func.func @transform_1(%arg0: i32, %arg1: i32) -> (i32, i32) {
    %c0_i32 = arith.constant 0 : i32
    %c0_i32_0 = arith.constant 0 : i32
    return %c0_i32, %arg0 : i32, i32
  }
  func.func @transform_2(%arg0: i32, %arg1: i32) -> (i32, i32) {
    %c0_i32 = arith.constant 0 : i32
    %c0_i32_0 = arith.constant 0 : i32
    return %c0_i32, %arg0 : i32, i32
  }
  func.func @transform_3(%arg0: i32, %arg1: i32) -> (i32, i32) {
    %c0_i32 = arith.constant 0 : i32
    return %arg1, %arg0 : i32, i32
  }
}

</mosaic_0001>

<bundles_post_ra>
// kernel: tpu_custom_call.1
= control target key start
LH: loop header
LB: loop body
LE: loop exit
PB: predicated region body
PF: predicated region fallthrough
CT: control target
= control target key end

     0   :  { %8 = vsyncpa [#allocation3], 0  ;;  %s245_s0 = inlined_call_operand.hbm [shape: f32[16,32], index: 0, kind: input, shape index: {}]   ;;  %s246_s1 = inlined_call_operand.hbm [shape: f32[32,128], index: 1, kind: input, shape index: {}]   ;;  %s247_s2 = inlined_call_operand.vmem [shape: f32[1,128], index: 2, kind: input, shape index: {}]   ;;  %s248_s3 = inlined_call_operand.hbm [shape: f32[16,128], index: 3, kind: output, shape index: {}]  }
   0x1   :  { %9 = vsyncpa [#allocation6], 0 }
   0x2   :  { %10 = vsyncpa [#allocation4], 0  ;;  %s15_s14 = sshll.u32 %s245_s0, 4  ;;  %s199_s15 = smov [#allocation2]   ;;  %s16_s14 = int_to_ptr.hbm [resolvable:$true] %s15_s14 }
   0x3   :  { %s17_s16 = sshll.u32 %s199_s15, 4  ;;  %s28_s19 = sshll.u32 %s246_s1, 4  ;;  %s18_s16 = int_to_ptr.vmem [resolvable:$true] %s17_s16  ;;  %s29_s19 = int_to_ptr.hbm [resolvable:$true] %s28_s19 }
   0x4   :  { %s200_s20 = smov 128   ;;  %s201_s21 = smov 8  }
   0x5   :  { %23 = dma.hbm_to_vmem [thread:$0]  %s16_s14, 256, %s18_s16, [#allocation3], %s200_s20, %s200_s20, %s201_s21  }
   0x6   :  { %s202_s22 = smov [#allocation5]  }
   0x7   :  { %s30_s23 = sshll.u32 %s202_s22, 4  ;;  %s31_s23 = int_to_ptr.vmem [resolvable:$true] %s30_s23 }
   0x8   :  { %36 = dma.hbm_to_vmem [thread:$0]  %s29_s19, 512, %s31_s23, [#allocation6], %s200_s20, %s200_s20, %s201_s21  }
   0x9   :  { %193 = dma.done.wait [#allocation3], 256  }
   0xa   :  { %194 = vsyncadd [#allocation3], 4294967040 }
   0xb   :  { %195 = dma.done.wait [#allocation6], 512  }
   0xc   :  { %196 = vsyncadd [#allocation6], 4294966784  ;;  %v52_v0 = vld [vmem:[#allocation5 + $0x18] sm:$0xff]  ;;  %v51_v1 = vld [vmem:[#allocation5 + $0x10] sm:$0xff]  ;;  %vm57_vm0 = vcmask 261120   ;;  %s203_s24 = smov [#allocation7]  }
   0xd   :  { %76 = vmatpush.msra.mxu0 %v52_v0  ;;  %111 = vmatpush.msra.mxu1 %v52_v0  ;;  %v50_v2 = vld [vmem:[#allocation5 + $0x8] sm:$0xff]  ;;  %v49_v3 = vld [vmem:[#allocation5] sm:$0xff]  ;;  %v47_v4 = vld [vmem:[#allocation2] sm:$0xff]  ;;  %s93_s25 = sshll.u32 %s203_s24, 4  ;;  %s95_s28 = sshll.u32 %s248_s3, 4  ;;  %s94_s25 = int_to_ptr.vmem [resolvable:$true] %s93_s25  ;;  %s96_s28 = int_to_ptr.hbm [resolvable:$true] %s95_s28 }
   0xe   :  { %v48_v5 = vld [vmem:[#allocation2 + $0x8] sm:$0xff]  ;;  %v120_v6 = vld [vmem:[%s247_s2] ss:$0 sm:$0xff] }
   0xf   :  { %77 = vmatpush.msra.mxu0 %v51_v1  ;;  %112 = vmatpush.msra.mxu1 %v51_v1 }
  0x11   :  { %78 = vmatpush.msra.mxu0 %v50_v2  ;;  %113 = vmatpush.msra.mxu1 %v50_v2 }
  0x13   :  { %79 = vmatpush.msra.mxu0 %v49_v3  ;;  %114 = vmatpush.msra.mxu1 %v49_v3 }
  0x14   :  { %109 = vmatmul.msk.f32.vlgmr.msra.gmra.mxu0 %vm57_vm0, %v47_v4  ;;  %110 = vmatmul.msk.f32.vlgmr.msra.gmra.mxu1 %vm57_vm0, %v48_v5 }
  0x91   :  { %v81_v7 = vpop.f32.mrf.mxu0  ;;  %v84_v8 = vpop.f32.mrf.mxu1 }
  0x92   :  { %v82_v9 = vadd.f32 %v120_v6, %v81_v7  ;;  %v85_v10 = vadd.f32 %v120_v6, %v84_v8 }
  0x94   :  { %87 = vst [vmem:[#allocation7] sm:$0xff] %v82_v9 }
  0x95   :  { %88 = vst [vmem:[#allocation7 + $0x8] sm:$0xff] %v85_v10 }
  0x96   :  { %101 = dma.vmem_to_hbm [thread:$0]  %s94_s25, 256, %s96_s28, [#allocation4], %s200_s20, %s200_s20, %s201_s21  }
  0x97   :  { %197 = dma.done.wait [#allocation4], 256  }
  0x98   :  { %198 = vsyncadd [#allocation4], 4294967040 }
  0x99   :  { %106 = vsyncpa [#allocation3], 1 }
  0x9a   :  { %107 = vsyncpa [#allocation6], 1 }
  0x9b   :  { %108 = vsyncpa [#allocation4], 1 }

</bundles_post_ra>
